<compile_context>
chip_gen: v7x
topology: tpu7x:2x2x1
jax: 0.10.0
libtpu: 0.0.40
codegen_flags: <defaults>
</compile_context>

<pallas_src>
import functools

import jax
import jax.numpy as jnp
from jax.experimental import pallas as pl
from jax.experimental.pallas import tpu as pltpu


def _round_up(x, m):
    return (x + m - 1) // m * m


def _multi_tensorcore():
    """True on chips with >1 TensorCore per chip (v3/v4/v5p/v7x). Perf-only heuristic."""
    try:
        kind = jax.devices()[0].device_kind.lower()
    except Exception:
        return False
    return any(tag in kind for tag in ("v7", "v4", "v3", "v5p"))


# ---------------------------------------------------------------------------
# Layer-0 tiling / one-time weight preparation (hoisted out of the forward path).
# ---------------------------------------------------------------------------
def choose_layer0_tiling(K, N, *, tk_max=16384):
    """Pick (tk, tn) and zero-padded sizes for the streaming layer-0 kernel."""
    Np = _round_up(N, 128)
    if _multi_tensorcore() and Np % 256 == 0 and Np // 256 >= 2:
        tn = 256            # two+ parallel N tiles -> one per TensorCore (v7x megacore)
    elif Np <= 512:
        tn = Np             # single contiguous full-width weight stream (v5e/v6e)
    elif Np % 512 == 0:
        tn = 512
    elif Np % 256 == 0:
        tn = 256
    else:
        tn = 128
    tk = min(tk_max, _round_up(K, 128))
    # Keep the double-buffered bf16 W tile <= 32 MiB (fits every generation's VMEM,
    # including v7x's 64 MiB physical).
    while 2 * tk * tn * 2 > 32 * 1024 * 1024 and tk > 1024:
        tk //= 2
    Kp = _round_up(K, tk)   # zero-padded K: no partial (unmasked) reduction blocks
    return dict(K=K, N=N, Kp=Kp, Np=Np, tk=tk, tn=tn)


def prepare_layer0_params(w, b, cfg):
    """One-time (init/load-time) prep of the huge layer-0 weight.

    w: (K, N) float, b: (1, N) float.
    Returns w_tiled (Np//tn, Kp, tn) bf16 -- each N tile is a contiguous HBM slab so
    the per-core weight stream is a linear DMA -- and b_padded (1, Np) f32.
    Padding is zero-filled, hence numerically exact (padded rows/cols contribute 0).
    """
    K, N = cfg["K"], cfg["N"]
    Kp, Np, tn = cfg["Kp"], cfg["Np"], cfg["tn"]
    assert w.shape == (K, N)
    w = jnp.pad(jnp.asarray(w).astype(jnp.bfloat16), ((0, Kp - K), (0, Np - N)))
    w_tiled = jnp.transpose(w.reshape(Kp, Np // tn, tn), (1, 0, 2))
    b_padded = jnp.pad(jnp.asarray(b, jnp.float32).reshape(1, N), ((0, 0), (0, Np - N)))
    return w_tiled, b_padded


# ---------------------------------------------------------------------------
# Kernel 1: streaming linear (+ optional ReLU) for the large-K layer.
#   Y = [relu](X @ W + b)   X:(B,Kp) bf16, W:(NT,Kp,tn) bf16, b:(1,Np) f32, Y:(B,Np) f32
# Grid = (NT [parallel over output tiles -> megacore], Kp//tk [reduction, innermost]).
# ---------------------------------------------------------------------------
def _streaming_linear_kernel(x_ref, w_ref, b_ref, o_ref, *, apply_relu):
    k = pl.program_id(1)

    @pl.when(k == 0)
    def _():
        o_ref[...] = jnp.zeros_like(o_ref)

    # The output block index is constant across the K axis, so o_ref stays resident
    # in VMEM for the whole reduction: accumulate straight into it (no scratch copy).
    o_ref[...] += jnp.dot(x_ref[...], w_ref[0], preferred_element_type=jnp.float32)

    @pl.when(k == pl.num_programs(1) - 1)
    def _():
        y = o_ref[...] + b_ref[...]
        if apply_relu:
            y = jnp.maximum(y, 0.0)
        o_ref[...] = y


def pallas_streaming_linear(x_padded, w_tiled, b_padded, cfg, *, relu):
    """x_padded: (B, Kp) bf16; w_tiled: (NT, Kp, tn) bf16; b_padded: (1, Np) f32."""
    B, Kp = x_padded.shape
    NT, Kp_w, tn = w_tiled.shape
    tk, Np, N = cfg["tk"], cfg["Np"], cfg["N"]
    assert Kp == Kp_w == cfg["Kp"] and Np == NT * tn and Kp % tk == 0

    # Double-buffered W + X tiles, bias, resident output (+25% headroom).
    need = 2 * (tk * tn * 2 + B * tk * 2 + tn * 4 + B * tn * 4)
    vmem_limit = min(64 * 1024 * 1024, max(32 * 1024 * 1024, int(need * 1.25)))

    out = pl.pallas_call(
        functools.partial(_streaming_linear_kernel, apply_relu=relu),
        out_shape=jax.ShapeDtypeStruct((B, Np), jnp.float32),
        grid_spec=pltpu.PrefetchScalarGridSpec(
            num_scalar_prefetch=0,
            grid=(NT, Kp // tk),                                    # K innermost (reduction)
            in_specs=[
                pl.BlockSpec((B, tk), lambda n, k: (0, k)),         # X tile (tiny)
                pl.BlockSpec((1, tk, tn), lambda n, k: (n, k, 0)),  # contiguous W slab
                pl.BlockSpec((1, tn), lambda n, k: (0, n)),         # bias
            ],
            out_specs=pl.BlockSpec((B, tn), lambda n, k: (0, n)),
        ),
        compiler_params=pltpu.CompilerParams(
            dimension_semantics=("parallel", "arbitrary"),
            vmem_limit_bytes=vmem_limit,
        ),
        # TODO(synk): if xprof still shows exposed DMA at step boundaries, add
        # pipeline_mode=pl.Buffered(3) on the W BlockSpec (VMEM headroom permitting).
    )(x_padded, w_tiled, b_padded)

    return out[:, :N] if Np != N else out


# ---------------------------------------------------------------------------
# Kernel 2: fused tail MLP.  All remaining (tiny) layers in one pallas_call with
# weights fully resident in VMEM; intermediate lane dims padded to 128.
# ---------------------------------------------------------------------------
def _fused_tail_kernel(*refs, n_layers):
    x_ref = refs[0]
    o_ref = refs[1 + 2 * n_layers]
    h = x_ref[...]
    for i in range(n_layers):
        w = refs[1 + 2 * i][...]
        b = refs[2 + 2 * i][...]
        h = jnp.dot(h, w, preferred_element_type=jnp.float32) + b
        if i < n_layers - 1:
            h = jnp.maximum(h, 0.0)
    o_ref[...] = h.astype(o_ref.dtype)


def pallas_fused_tail(h, tail_params):
    """h: (B, D0) f32; tail_params: [(w (D_{i-1}, D_i), b (1, D_i))], ReLU between layers."""
    B, D0 = h.shape
    n_layers = len(tail_params)
    assert n_layers >= 1 and tail_params[0][0].shape[0] == D0

    kp = _round_up(D0, 128)
    if kp != D0:
        h = jnp.pad(h, ((0, 0), (0, kp - D0)))
    args = [h.astype(jnp.float32)]
    for (w, b) in tail_params:
        K, N = w.shape
        Np = _round_up(N, 128)
        # Zero-pad: padded output lanes stay 0 through ReLU; padded input rows are 0.
        args.append(jnp.pad(w.astype(jnp.float32), ((0, kp - K), (0, Np - N))))
        args.append(jnp.pad(b.astype(jnp.float32), ((0, 0), (0, Np - N))))
        kp = Np

    vmem = pltpu.MemorySpace.VMEM
    out = pl.pallas_call(
        functools.partial(_fused_tail_kernel, n_layers=n_layers),
        out_shape=jax.ShapeDtypeStruct((B, kp), jnp.float32),
        in_specs=[pl.BlockSpec(memory_space=vmem)] * len(args),
        out_specs=pl.BlockSpec(memory_space=vmem),
    )(*args)

    n_final = tail_params[-1][0].shape[1]
    return out[:, :n_final]
    # TODO(synk): on single-TC configs (NT == 1) fold this tail into the streaming
    # kernel's last-K epilogue (weights as extra resident VMEM inputs) to drop the
    # second launch and the hidden-activation HBM round trip.


# ---------------------------------------------------------------------------
# Parameters + forward (matches PyTorch DNAm_MLP semantics).
# ---------------------------------------------------------------------------
def init_params(key, input_size, hidden_sizes, output_size):
    """PyTorch-like uniform(-1/sqrt(fan_in), 1/sqrt(fan_in)) init, plus one-time
    layer-0 weight prep (bf16 cast, zero-pad, contiguous N-tile layout) so the
    per-forward path never copies the ~287 MB weight."""
    dims = [input_size] + list(hidden_sizes) + [output_size]
    raw = []
    for i in range(len(dims) - 1):
        fan_in, fan_out = dims[i], dims[i + 1]
        key, kw, kb = jax.random.split(key, 3)
        bound = 1.0 / (fan_in ** 0.5)
        w = jax.random.uniform(kw, (fan_in, fan_out), jnp.float32, -bound, bound)
        b = jax.random.uniform(kb, (1, fan_out), jnp.float32, -bound, bound)
        raw.append((w, b))

    cfg = choose_layer0_tiling(input_size, dims[1])
    w0_tiled, b0_padded = prepare_layer0_params(raw[0][0], raw[0][1], cfg)
    # TODO(synk): quantize the layer-0 weight stream (int8 on v5e/v6e, fp8 on v7x)
    # with per-output-channel scales applied in the epilogue (~2x on the weight-bound
    # layer) once accuracy is validated.
    return {
        "cfg": cfg,
        "layer0": (w0_tiled, b0_padded),
        "tail": [(w.astype(jnp.float32), b) for (w, b) in raw[1:]],
    }


def dnam_mlp_forward(x, params):
    """ReLU after every layer except the last, like DNAm_MLP.forward."""
    cfg = params["cfg"]
    K, Kp = cfg["K"], cfg["Kp"]
    xb = x.astype(jnp.bfloat16)
    if Kp != K:                       # only the tiny activation is padded per call
        xb = jnp.pad(xb, ((0, 0), (0, Kp - K)))
    w0_tiled, b0_padded = params["layer0"]
    h = pallas_streaming_linear(xb, w0_tiled, b0_padded, cfg, relu=True)
    if params["tail"]:
        h = pallas_fused_tail(h, params["tail"])
    return h
    # TODO(synk): if batch grows well beyond 8, add a parallel M (batch) grid axis
    # (tile 128/256) to the streaming kernel -- unnecessary at B=8 (weight-stream bound).


def dnam_mlp_reference(x, params):
    """Pure-JAX reference using the same (bf16-rounded) layer-0 operands."""
    cfg = params["cfg"]
    K, N, tn = cfg["K"], cfg["N"], cfg["tn"]
    w0_tiled, b0_padded = params["layer0"]
    NT, Kp, _ = w0_tiled.shape
    w0 = jnp.transpose(w0_tiled, (1, 0, 2)).reshape(Kp, NT * tn)[:K, :N].astype(jnp.float32)
    hp = jax.lax.Precision.HIGHEST
    h = x.astype(jnp.bfloat16).astype(jnp.float32)
    h = jnp.maximum(jnp.dot(h, w0, precision=hp) + b0_padded[:, :N], 0.0)
    tail = params["tail"]
    for i, (w, b) in enumerate(tail):
        h = jnp.dot(h, w, precision=hp) + b
        if i < len(tail) - 1:
            h = jnp.maximum(h, 0.0)
    return h


if __name__ == "__main__":
    # Small shapes consistent with the module (true input_size=280257 scaled down).
    # input_size deliberately NOT a multiple of 128 to exercise the zero-padded-K path.
    batch = 8
    input_size = 1000
    hidden_sizes = [512, 256, 128, 64, 32]
    output_size = 1

    key = jax.random.PRNGKey(0)
    key, kx = jax.random.split(key)
    x = jax.random.normal(kx, (batch, input_size), jnp.float32)

    params = init_params(key, input_size, hidden_sizes, output_size)

    out = jax.block_until_ready(dnam_mlp_forward(x, params))
    ref = dnam_mlp_reference(x, params)

    assert out.shape == (batch, output_size)
    assert jnp.allclose(out, ref, atol=2e-3, rtol=2e-3), float(jnp.max(jnp.abs(out - ref)))

    print("KERNEL_OK")
</pallas_src>

<mosaic_0001>
module attributes {stable_mosaic.version = 11 : i64} {
  func.func @_streaming_linear_kernel(%arg0: i32, %arg1: i32, %arg2: memref<8x1024xbf16, #tpu.memory_space<vmem>>, %arg3: memref<1x1024x512xbf16, #tpu.memory_space<vmem>>, %arg4: memref<1x512xf32, #tpu.memory_space<vmem>>, %arg5: memref<8x512xf32, #tpu.memory_space<vmem>>) attributes {dimension_semantics = [#tpu.dimension_semantics<parallel>, #tpu.dimension_semantics<arbitrary>], iteration_bounds = array<i64: 1, 1>, scalar_prefetch = 0 : i64, scratch_operands = 0 : i64, tpu.core_type = #tpu.core_type<tc>, window_params = [{transform_indices = @transform_0, window_bounds = array<i64: 8, 1024>}, {transform_indices = @transform_1, window_bounds = array<i64: 1, 1024, 512>}, {transform_indices = @transform_2, window_bounds = array<i64: 1, 512>}, {transform_indices = @transform_3, window_bounds = array<i64: 8, 512>}]} {
    %c0_i32 = arith.constant 0 : i32
    %0 = arith.cmpi eq, %arg1, %c0_i32 : i32
    %1 = arith.extui %0 : i1 to i32
    %c0_i32_0 = arith.constant 0 : i32
    %2 = arith.cmpi ne, %1, %c0_i32_0 : i32
    scf.if %2 {
      %cst_11 = arith.constant 0.000000e+00 : f32
      %13 = vector.broadcast %cst_11 : f32 to vector<8x512xf32>
      %c0_12 = arith.constant 0 : index
      %c0_13 = arith.constant 0 : index
      %14 = vector.load %arg5[%c0_12, %c0_13] : memref<8x512xf32, #tpu.memory_space<vmem>>, vector<8x512xf32>
      tpu.vector_store %arg5[%c0_12, %c0_13], %13 {strides = array<i32>} : memref<8x512xf32, #tpu.memory_space<vmem>>, vector<8x512xf32>,
    } else {
    }
    %c0 = arith.constant 0 : index
    %c0_1 = arith.constant 0 : index
    %3 = vector.load %arg5[%c0, %c0_1] : memref<8x512xf32, #tpu.memory_space<vmem>>, vector<8x512xf32>
    %c0_2 = arith.constant 0 : index
    %c0_3 = arith.constant 0 : index
    %4 = vector.load %arg2[%c0_2, %c0_3] : memref<8x1024xbf16, #tpu.memory_space<vmem>>, vector<8x1024xbf16>
    %c0_4 = arith.constant 0 : index
    %c0_5 = arith.constant 0 : index
    %c0_6 = arith.constant 0 : index
    %5 = vector.load %arg3[%c0_4, %c0_5, %c0_6] : memref<1x1024x512xbf16, #tpu.memory_space<vmem>>, vector<1x1024x512xbf16>
    %6 = vector.shape_cast %5 : vector<1x1024x512xbf16> to vector<1024x512xbf16>
    %cst = arith.constant dense<0.000000e+00> : vector<8x512xf32>
    %7 = tpu.matmul %4, %6, %cst {dimension_numbers = #tpu.dot_dimension_numbers<[1], [0], [0], [1], [0, 0, 1, 1], [], []>} : vector<8x1024xbf16>, vector<1024x512xbf16>, vector<8x512xf32> -> vector<8x512xf32>
    %8 = arith.addf %3, %7 : vector<8x512xf32>
    %c0_7 = arith.constant 0 : index
    %c0_8 = arith.constant 0 : index
    %9 = vector.load %arg5[%c0_7, %c0_8] : memref<8x512xf32, #tpu.memory_space<vmem>>, vector<8x512xf32>
    tpu.vector_store %arg5[%c0_7, %c0_8], %8 {strides = array<i32>} : memref<8x512xf32, #tpu.memory_space<vmem>>, vector<8x512xf32>,
    %c0_i32_9 = arith.constant 0 : i32
    %10 = arith.cmpi eq, %arg1, %c0_i32_9 : i32
    %11 = arith.extui %10 : i1 to i32
    %c0_i32_10 = arith.constant 0 : i32
    %12 = arith.cmpi ne, %11, %c0_i32_10 : i32
    scf.if %12 {
      %c0_11 = arith.constant 0 : index
      %c0_12 = arith.constant 0 : index
      %13 = vector.load %arg5[%c0_11, %c0_12] : memref<8x512xf32, #tpu.memory_space<vmem>>, vector<8x512xf32>
      %c0_13 = arith.constant 0 : index
      %c0_14 = arith.constant 0 : index
      %14 = vector.load %arg4[%c0_13, %c0_14] : memref<1x512xf32, #tpu.memory_space<vmem>>, vector<1x512xf32>
      %15 = vector.broadcast %14 : vector<1x512xf32> to vector<8x512xf32>
      %16 = arith.addf %13, %15 : vector<8x512xf32>
      %cst_15 = arith.constant 0.000000e+00 : f32
      %17 = vector.broadcast %cst_15 : f32 to vector<8x512xf32>
      %18 = arith.maximumf %16, %17 : vector<8x512xf32>
      %c0_16 = arith.constant 0 : index
      %c0_17 = arith.constant 0 : index
      %19 = vector.load %arg5[%c0_16, %c0_17] : memref<8x512xf32, #tpu.memory_space<vmem>>, vector<8x512xf32>
      tpu.vector_store %arg5[%c0_16, %c0_17], %18 {strides = array<i32>} : memref<8x512xf32, #tpu.memory_space<vmem>>, vector<8x512xf32>,
    } else {
    }
    return
  }
  func.func @transform_0(%arg0: i32, %arg1: i32) -> (i32, i32) {
    %c0_i32 = arith.constant 0 : i32
    %c0_i32_0 = arith.constant 0 : i32
    return %c0_i32, %arg1 : i32, i32
  }
  func.func @transform_1(%arg0: i32, %arg1: i32) -> (i32, i32, i32) {
    %c0_i32 = arith.constant 0 : i32
    %c0_i32_0 = arith.constant 0 : i32
    return %arg0, %arg1, %c0_i32 : i32, i32, i32
  }
  func.func @transform_2(%arg0: i32, %arg1: i32) -> (i32, i32) {
    %c0_i32 = arith.constant 0 : i32
    %c0_i32_0 = arith.constant 0 : i32
    return %c0_i32, %arg0 : i32, i32
  }
  func.func @transform_3(%arg0: i32, %arg1: i32) -> (i32, i32) {
    %c0_i32 = arith.constant 0 : i32
    %c0_i32_0 = arith.constant 0 : i32
    return %c0_i32, %arg0 : i32, i32
  }
}

</mosaic_0001>

<bundles_post_ra>
// kernel: tpu_custom_call.1
= control target key start
LH: loop header
LB: loop body
LE: loop exit
PB: predicated region body
PF: predicated region fallthrough
CT: control target
= control target key end

     0   :  { %8 = vsyncpa [#allocation3], 0  ;;  %s2863_s0 = inlined_call_operand.hbm [shape: bf16[8,1024], index: 0, kind: input, shape index: {}]   ;;  %s2864_s1 = inlined_call_operand.hbm [shape: bf16[1,1024,512], index: 1, kind: input, shape index: {}]   ;;  %s2865_s2 = inlined_call_operand.vmem [shape: f32[1,512], index: 2, kind: input, shape index: {}]   ;;  %s2866_s3 = inlined_call_operand.hbm [shape: f32[8,512], index: 3, kind: output, shape index: {}]  }
   0x1   :  { %9 = vsyncpa [#allocation6], 0 }
   0x2   :  { %10 = vsyncpa [#allocation4], 0  ;;  %s2748_s12 = smov [#allocation2]   ;;  %s2749_s14 = smov [#allocation5]  }
   0x3   :  { %s17_s13 = sshll.u32 %s2748_s12, 4  ;;  %s26_s15 = sshll.u32 %s2749_s14, 4  ;;  %s18_s13 = int_to_ptr.vmem [resolvable:$true] %s17_s13  ;;  %s2773_s15 = int_to_ptr.vmem [resolvable:$true] %s26_s15 }
   0x4   :  { %s2676_s18 = scalar_lea.hbm %s2863_s0, 512 }
   0x5   :  { %p2677_p0 = scmp.ne.s32.totalorder %s2863_s0, %s2676_s18  ;;  %p2680_p1 = scmp.lt.u32.totalorder %s2676_s18, %s2863_s0 }
   0x7   :  { %p2682_p2 = pnand %p2680_p1, %p2677_p0 }
   0x9   :  { %2685 = shalt.err (!%p2682_p2)
}
   0xa   :  { %s2686_s23 = scalar_lea.vmem %s18_s13, 512  ;;  %p2691_p4 = scmp.lt.s32.totalorder %s18_s13, %s18_s13 }
   0xb   :  { %p2687_p3 = scmp.ne.s32.totalorder %s18_s13, %s2686_s23  ;;  %p2692_p5 = scmp.lt.s32.totalorder %s2686_s23, %s2686_s23 }
   0xd   :  { %p2693_p6 = por %p2692_p5, %p2691_p4 }
   0xf   :  { %p2694_p7 = pnand %p2693_p6, %p2687_p3 }
  0x11   :  { %2697 = shalt.err (!%p2694_p7)
}
  0x12   :  { %20 = dma.hbm_to_vmem [thread:$0]  %s2863_s0, 512, %s18_s13, [#allocation3]  }
  0x13   :  { %s2698_s28 = scalar_lea.hbm %s2864_s1, 32768 }
  0x14   :  { %p2699_p8 = scmp.ne.s32.totalorder %s2864_s1, %s2698_s28  ;;  %p2702_p9 = scmp.lt.u32.totalorder %s2698_s28, %s2864_s1 }
  0x16   :  { %p2704_p10 = pnand %p2702_p9, %p2699_p8 }
  0x18   :  { %2707 = shalt.err (!%p2704_p10)
}
  0x19   :  { %s2708_s6 = scalar_lea.vmem %s2773_s15, 32768  ;;  %p2713_p12 = scmp.lt.s32.totalorder %s2773_s15, %s2773_s15 }
  0x1a   :  { %p2709_p11 = scmp.ne.s32.totalorder %s2773_s15, %s2708_s6  ;;  %p2714_p13 = scmp.lt.s32.totalorder %s2708_s6, %s2708_s6 }
  0x1c   :  { %p2715_p0 = por %p2714_p13, %p2713_p12 }
  0x1e   :  { %p2716_p1 = pnand %p2715_p0, %p2709_p11 }
  0x20   :  { %2719 = shalt.err (!%p2716_p1)
}
  0x21   :  { %s2750_s0 = smov 256   ;;  %s2751_s7 = smov 16  }
  0x22   :  { %32 = dma.hbm_to_vmem [thread:$0]  %s2864_s1, 32768, %s2773_s15, [#allocation6], %s2750_s0, %s2750_s0, %s2751_s7  }
  0x23   :  { %2742 = dma.done.wait [#allocation3], 512  }
  0x24   :  { %2743 = vsyncadd [#allocation3], 4294966784 }
  0x25   :  { %2744 = dma.done.wait [#allocation6], 32768  }
  0x26   :  { %2745 = vsyncadd [#allocation6], 4294934528  ;;  %v2284_v0 = vld [vmem:[#allocation5 + $0x4] ss:$16 sps:$4 sm:$0xff]   ;;  %v2288_v2 = vld [vmem:[#allocation5] ss:$16 sps:$4 sm:$0xff]  }
  0x27   :  { %v2286_v1 = vld [vmem:[#allocation5 + $0x204] ss:$16 sps:$4 sm:$0xff]   ;;  %1621 = vmatprep.subr.bf16.mxu0 %v2284_v0  ;;  %v2289_v3 = vld [vmem:[#allocation5 + $0x200] ss:$16 sps:$4 sm:$0xff]   ;;  %v54_v48 = vld [vmem:[#allocation2 + $0x8] sm:$0xff] }
  0x28   :  { %1662 = vmatprep.subr.bf16.mxu1 %v2286_v1  ;;  %v2290_v4 = vld [vmem:[#allocation5 + $0x24] ss:$16 sps:$4 sm:$0xff]   ;;  %1622 = vmatpush1.bf16.msra.mxu0 %v2288_v2  ;;  %v2294_v6 = vld [vmem:[#allocation5 + $0x20] ss:$16 sps:$4 sm:$0xff]   ;;  %v2806_v51 = vcombine.high %v54_v48, %v54_v48 }
  0x29   :  { %1663 = vmatpush1.bf16.msra.mxu1 %v2289_v3  ;;  %v2292_v5 = vld [vmem:[#allocation5 + $0x224] ss:$16 sps:$4 sm:$0xff]   ;;  %1623 = vmatprep.subr.bf16.mxu0 %v2290_v4  ;;  %v2295_v7 = vld [vmem:[#allocation5 + $0x220] ss:$16 sps:$4 sm:$0xff]  }
  0x2a   :  { %1664 = vmatprep.subr.bf16.mxu1 %v2292_v5  ;;  %v2296_v8 = vld [vmem:[#allocation5 + $0x44] ss:$16 sps:$4 sm:$0xff]   ;;  %v2300_v10 = vld [vmem:[#allocation5 + $0x40] ss:$16 sps:$4 sm:$0xff]   ;;  %1694 = vmatprep.mubr.bf16.mxu1 %v2806_v51 }
  0x2b   :  { %v2298_v9 = vld [vmem:[#allocation5 + $0x244] ss:$16 sps:$4 sm:$0xff]   ;;  %v2301_v11 = vld [vmem:[#allocation5 + $0x240] ss:$16 sps:$4 sm:$0xff]  }
  0x2c   :  { %1624 = vmatpush1.bf16.msra.mxu0 %v2294_v6  ;;  %v2302_v12 = vld [vmem:[#allocation5 + $0x64] ss:$16 sps:$4 sm:$0xff]   ;;  %v2306_v14 = vld [vmem:[#allocation5 + $0x60] ss:$16 sps:$4 sm:$0xff]  }
  0x2d   :  { %1665 = vmatpush1.bf16.msra.mxu1 %v2295_v7  ;;  %1625 = vmatprep.subr.bf16.mxu0 %v2296_v8  ;;  %v2304_v13 = vld [vmem:[#allocation5 + $0x264] ss:$16 sps:$4 sm:$0xff]   ;;  %v2307_v15 = vld [vmem:[#allocation5 + $0x260] ss:$16 sps:$4 sm:$0xff]   ;;  %v2812_v7 = vcombine.low %v54_v48, %v54_v48 }
  0x2e   :  { %1666 = vmatprep.subr.bf16.mxu1 %v2298_v9  ;;  %v2308_v16 = vld [vmem:[#allocation5 + $0x84] ss:$16 sps:$4 sm:$0xff]   ;;  %v2312_v18 = vld [vmem:[#allocation5 + $0x80] ss:$16 sps:$4 sm:$0xff]  }
  0x2f   :  { %v2310_v17 = vld [vmem:[#allocation5 + $0x284] ss:$16 sps:$4 sm:$0xff]   ;;  %v2313_v19 = vld [vmem:[#allocation5 + $0x280] ss:$16 sps:$4 sm:$0xff]  }
  0x30   :  { %1626 = vmatpush1.bf16.msra.mxu0 %v2300_v10  ;;  %v2314_v20 = vld [vmem:[#allocation5 + $0xa4] ss:$16 sps:$4 sm:$0xff]   ;;  %v2318_v22 = vld [vmem:[#allocation5 + $0xa0] ss:$16 sps:$4 sm:$0xff]  }
  0x31   :  { %1667 = vmatpush1.bf16.msra.mxu1 %v2301_v11  ;;  %1627 = vmatprep.subr.bf16.mxu0 %v2302_v12  ;;  %v2316_v21 = vld [vmem:[#allocation5 + $0x2a4] ss:$16 sps:$4 sm:$0xff]   ;;  %v2319_v23 = vld [vmem:[#allocation5 + $0x2a0] ss:$16 sps:$4 sm:$0xff]  }
  0x32   :  { %1668 = vmatprep.subr.bf16.mxu1 %v2304_v13  ;;  %v2320_v24 = vld [vmem:[#allocation5 + $0xc4] ss:$16 sps:$4 sm:$0xff]   ;;  %v2324_v26 = vld [vmem:[#allocation5 + $0xc0] ss:$16 sps:$4 sm:$0xff]  }
  0x33   :  { %v2322_v25 = vld [vmem:[#allocation5 + $0x2c4] ss:$16 sps:$4 sm:$0xff]   ;;  %v2325_v27 = vld [vmem:[#allocation5 + $0x2c0] ss:$16 sps:$4 sm:$0xff]  }
  0x34   :  { %1628 = vmatpush1.bf16.msra.mxu0 %v2306_v14  ;;  %v2326_v28 = vld [vmem:[#allocation5 + $0xe4] ss:$16 sps:$4 sm:$0xff]   ;;  %v2330_v30 = vld [vmem:[#allocation5 + $0xe0] ss:$16 sps:$4 sm:$0xff]  }
  0x35   :  { %1669 = vmatpush1.bf16.msra.mxu1 %v2307_v15  ;;  %1629 = vmatprep.subr.bf16.mxu0 %v2308_v16  ;;  %v2328_v29 = vld [vmem:[#allocation5 + $0x2e4] ss:$16 sps:$4 sm:$0xff]   ;;  %v2331_v31 = vld [vmem:[#allocation5 + $0x2e0] ss:$16 sps:$4 sm:$0xff]  }
  0x36   :  { %1670 = vmatprep.subr.bf16.mxu1 %v2310_v17  ;;  %v2332_v32 = vld [vmem:[#allocation5 + $0x104] ss:$16 sps:$4 sm:$0xff]   ;;  %v2336_v34 = vld [vmem:[#allocation5 + $0x100] ss:$16 sps:$4 sm:$0xff]  }
  0x37   :  { %v2334_v33 = vld [vmem:[#allocation5 + $0x304] ss:$16 sps:$4 sm:$0xff]   ;;  %v2337_v35 = vld [vmem:[#allocation5 + $0x300] ss:$16 sps:$4 sm:$0xff]  }
  0x38   :  { %1630 = vmatpush1.bf16.msra.mxu0 %v2312_v18  ;;  %v2338_v36 = vld [vmem:[#allocation5 + $0x124] ss:$16 sps:$4 sm:$0xff]   ;;  %v2342_v38 = vld [vmem:[#allocation5 + $0x120] ss:$16 sps:$4 sm:$0xff]  }
  0x39   :  { %1671 = vmatpush1.bf16.msra.mxu1 %v2313_v19  ;;  %1631 = vmatprep.subr.bf16.mxu0 %v2314_v20  ;;  %v2340_v37 = vld [vmem:[#allocation5 + $0x324] ss:$16 sps:$4 sm:$0xff]   ;;  %v2343_v39 = vld [vmem:[#allocation5 + $0x320] ss:$16 sps:$4 sm:$0xff]  }
  0x3a   :  { %1672 = vmatprep.subr.bf16.mxu1 %v2316_v21  ;;  %v2344_v40 = vld [vmem:[#allocation5 + $0x144] ss:$16 sps:$4 sm:$0xff]   ;;  %v2348_v42 = vld [vmem:[#allocation5 + $0x140] ss:$16 sps:$4 sm:$0xff]  }
  0x3b   :  { %v2346_v41 = vld [vmem:[#allocation5 + $0x344] ss:$16 sps:$4 sm:$0xff]   ;;  %v2349_v43 = vld [vmem:[#allocation5 + $0x340] ss:$16 sps:$4 sm:$0xff]  }
  0x3c   :  { %1632 = vmatpush1.bf16.msra.mxu0 %v2318_v22  ;;  %v2350_v44 = vld [vmem:[#allocation5 + $0x164] ss:$16 sps:$4 sm:$0xff]   ;;  %v2354_v49 = vld [vmem:[#allocation5 + $0x160] ss:$16 sps:$4 sm:$0xff]  }
  0x3d   :  { %1673 = vmatpush1.bf16.msra.mxu1 %v2319_v23  ;;  %1633 = vmatprep.subr.bf16.mxu0 %v2320_v24  ;;  %v2352_v45 = vld [vmem:[#allocation5 + $0x364] ss:$16 sps:$4 sm:$0xff]   ;;  %v2355_v50 = vld [vmem:[#allocation5 + $0x360] ss:$16 sps:$4 sm:$0xff]  }
  0x3e   :  { %1674 = vmatprep.subr.bf16.mxu1 %v2322_v25  ;;  %v53_v46 = vld [vmem:[#allocation2] sm:$0xff] }
  0x3f   :  { %v2804_v47 = vcombine.high %v53_v46, %v53_v46  ;;  %v2356_v52 = vld [vmem:[#allocation5 + $0x184] ss:$16 sps:$4 sm:$0xff]   ;;  %v2360_v54 = vld [vmem:[#allocation5 + $0x180] ss:$16 sps:$4 sm:$0xff]   ;;  %v2810_v6 = vcombine.low %v53_v46, %v53_v46 }
  0x40   :  { %1634 = vmatpush1.bf16.msra.mxu0 %v2324_v26  ;;  %v2358_v53 = vld [vmem:[#allocation5 + $0x384] ss:$16 sps:$4 sm:$0xff]   ;;  %v2361_v55 = vld [vmem:[#allocation5 + $0x380] ss:$16 sps:$4 sm:$0xff]  }
  0x41   :  { %1675 = vmatpush1.bf16.msra.mxu1 %v2325_v27  ;;  %1635 = vmatprep.subr.bf16.mxu0 %v2326_v28  ;;  %v2362_v56 = vld [vmem:[#allocation5 + $0x1a4] ss:$16 sps:$4 sm:$0xff]   ;;  %v2366_v58 = vld [vmem:[#allocation5 + $0x1a0] ss:$16 sps:$4 sm:$0xff]  }
  0x42   :  { %1676 = vmatprep.subr.bf16.mxu1 %v2328_v29  ;;  %1653 = vmatprep.mubr.bf16.mxu0 %v2804_v47  ;;  %v2364_v57 = vld [vmem:[#allocation5 + $0x3a4] ss:$16 sps:$4 sm:$0xff]   ;;  %v2367_v59 = vld [vmem:[#allocation5 + $0x3a0] ss:$16 sps:$4 sm:$0xff]  }
  0x43   :  { %v2368_v60 = vld [vmem:[#allocation5 + $0x1c4] ss:$16 sps:$4 sm:$0xff]   ;;  %v2372_v62 = vld [vmem:[#allocation5 + $0x1c0] ss:$16 sps:$4 sm:$0xff]  }
  0x44   :  { %1636 = vmatpush1.bf16.msra.mxu0 %v2330_v30  ;;  %v2370_v61 = vld [vmem:[#allocation5 + $0x3c4] ss:$16 sps:$4 sm:$0xff]   ;;  %v2373_v63 = vld [vmem:[#allocation5 + $0x3c0] ss:$16 sps:$4 sm:$0xff]  }
  0x45   :  { %1677 = vmatpush1.bf16.msra.mxu1 %v2331_v31  ;;  %1637 = vmatprep.subr.bf16.mxu0 %v2332_v32  ;;  %v2374_v0 = vld [vmem:[#allocation5 + $0x1e4] ss:$16 sps:$4 sm:$0xff]   ;;  %v2378_v2 = vld [vmem:[#allocation5 + $0x1e0] ss:$16 sps:$4 sm:$0xff]  }
  0x46   :  { %1678 = vmatprep.subr.bf16.mxu1 %v2334_v33  ;;  %v2376_v1 = vld [vmem:[#allocation5 + $0x3e4] ss:$16 sps:$4 sm:$0xff]   ;;  %v2379_v3 = vld [vmem:[#allocation5 + $0x3e0] ss:$16 sps:$4 sm:$0xff]   ;;  %v2818_v33 = vld [vmem:[#allocation2 + $0x18] sm:$0xff] }
  0x47   :  { %v2386_v4 = vld [vmem:[#allocation5 + $0x404] ss:$16 sps:$4 sm:$0xff]   ;;  %v2384_v8 = vld [vmem:[#allocation5 + $0x400] ss:$16 sps:$4 sm:$0xff]  }
  0x48   :  { %1638 = vmatpush1.bf16.msra.mxu0 %v2336_v34  ;;  %v2389_v5 = vld [vmem:[#allocation5 + $0x604] ss:$16 sps:$4 sm:$0xff]   ;;  %v2387_v9 = vld [vmem:[#allocation5 + $0x600] ss:$16 sps:$4 sm:$0xff]  }
  0x49   :  { %1679 = vmatpush1.bf16.msra.mxu1 %v2337_v35  ;;  %1639 = vmatprep.subr.bf16.mxu0 %v2338_v36  ;;  %v2392_v10 = vld [vmem:[#allocation5 + $0x424] ss:$16 sps:$4 sm:$0xff]   ;;  %v2390_v12 = vld [vmem:[#allocation5 + $0x420] ss:$16 sps:$4 sm:$0xff]  }
  0x4a   :  { %1680 = vmatprep.subr.bf16.mxu1 %v2340_v37  ;;  %v2395_v11 = vld [vmem:[#allocation5 + $0x624] ss:$16 sps:$4 sm:$0xff]   ;;  %v2393_v13 = vld [vmem:[#allocation5 + $0x620] ss:$16 sps:$4 sm:$0xff]   ;;  %v2826_v37 = vcombine.high %v2818_v33, %v2818_v33 }
  0x4b   :  { %v2398_v14 = vld [vmem:[#allocation5 + $0x444] ss:$16 sps:$4 sm:$0xff]   ;;  %v2396_v16 = vld [vmem:[#allocation5 + $0x440] ss:$16 sps:$4 sm:$0xff]  }
  0x4c   :  { %1640 = vmatpush1.bf16.msra.mxu0 %v2342_v38  ;;  %v2401_v15 = vld [vmem:[#allocation5 + $0x644] ss:$16 sps:$4 sm:$0xff]   ;;  %v2399_v17 = vld [vmem:[#allocation5 + $0x640] ss:$16 sps:$4 sm:$0xff]  }
  0x4d   :  { %1681 = vmatpush1.bf16.msra.mxu1 %v2343_v39  ;;  %1641 = vmatprep.subr.bf16.mxu0 %v2344_v40  ;;  %v2404_v18 = vld [vmem:[#allocation5 + $0x464] ss:$16 sps:$4 sm:$0xff]   ;;  %v2402_v20 = vld [vmem:[#allocation5 + $0x460] ss:$16 sps:$4 sm:$0xff]  }
  0x4e   :  { %1682 = vmatprep.subr.bf16.mxu1 %v2346_v41  ;;  %v2407_v19 = vld [vmem:[#allocation5 + $0x664] ss:$16 sps:$4 sm:$0xff]   ;;  %v2405_v21 = vld [vmem:[#allocation5 + $0x660] ss:$16 sps:$4 sm:$0xff]  }
  0x4f   :  { %v2410_v22 = vld [vmem:[#allocation5 + $0x484] ss:$16 sps:$4 sm:$0xff]   ;;  %v2408_v24 = vld [vmem:[#allocation5 + $0x480] ss:$16 sps:$4 sm:$0xff]  }
  0x50   :  { %1642 = vmatpush1.bf16.msra.mxu0 %v2348_v42  ;;  %v2413_v23 = vld [vmem:[#allocation5 + $0x684] ss:$16 sps:$4 sm:$0xff]   ;;  %v2411_v25 = vld [vmem:[#allocation5 + $0x680] ss:$16 sps:$4 sm:$0xff]  }
  0x51   :  { %1683 = vmatpush1.bf16.msra.mxu1 %v2349_v43  ;;  %1643 = vmatprep.subr.bf16.mxu0 %v2350_v44  ;;  %v2416_v26 = vld [vmem:[#allocation5 + $0x4a4] ss:$16 sps:$4 sm:$0xff]   ;;  %v2414_v28 = vld [vmem:[#allocation5 + $0x4a0] ss:$16 sps:$4 sm:$0xff]  }
  0x52   :  { %1684 = vmatprep.subr.bf16.mxu1 %v2352_v45  ;;  %v2419_v27 = vld [vmem:[#allocation5 + $0x6a4] ss:$16 sps:$4 sm:$0xff]   ;;  %v2417_v29 = vld [vmem:[#allocation5 + $0x6a0] ss:$16 sps:$4 sm:$0xff]  }
  0x53   :  { %v2422_v30 = vld [vmem:[#allocation5 + $0x4c4] ss:$16 sps:$4 sm:$0xff]   ;;  %v2420_v34 = vld [vmem:[#allocation5 + $0x4c0] ss:$16 sps:$4 sm:$0xff]  }
  0x54   :  { %1644 = vmatpush1.bf16.msra.mxu0 %v2354_v49  ;;  %v2425_v31 = vld [vmem:[#allocation5 + $0x6c4] ss:$16 sps:$4 sm:$0xff]   ;;  %v2423_v35 = vld [vmem:[#allocation5 + $0x6c0] ss:$16 sps:$4 sm:$0xff]  }
  0x55   :  { %1685 = vmatpush1.bf16.msra.mxu1 %v2355_v50  ;;  %1645 = vmatprep.subr.bf16.mxu0 %v2356_v52  ;;  %v2816_v32 = vld [vmem:[#allocation2 + $0x10] sm:$0xff] }
  0x56   :  { %1686 = vmatprep.subr.bf16.mxu1 %v2358_v53  ;;  %v2822_v36 = vcombine.high %v2816_v32, %v2816_v32  ;;  %v2428_v38 = vld [vmem:[#allocation5 + $0x4e4] ss:$16 sps:$4 sm:$0xff]   ;;  %v2426_v40 = vld [vmem:[#allocation5 + $0x4e0] ss:$16 sps:$4 sm:$0xff]  }
  0x57   :  { %v2431_v39 = vld [vmem:[#allocation5 + $0x6e4] ss:$16 sps:$4 sm:$0xff]   ;;  %v2429_v41 = vld [vmem:[#allocation5 + $0x6e0] ss:$16 sps:$4 sm:$0xff]  }
  0x58   :  { %1646 = vmatpush1.bf16.msra.mxu0 %v2360_v54  ;;  %v2434_v42 = vld [vmem:[#allocation5 + $0x504] ss:$16 sps:$4 sm:$0xff]   ;;  %v2432_v44 = vld [vmem:[#allocation5 + $0x500] ss:$16 sps:$4 sm:$0xff]  }
  0x59   :  { %1687 = vmatpush1.bf16.msra.mxu1 %v2361_v55  ;;  %1647 = vmatprep.subr.bf16.mxu0 %v2362_v56  ;;  %v2437_v43 = vld [vmem:[#allocation5 + $0x704] ss:$16 sps:$4 sm:$0xff]   ;;  %v2435_v45 = vld [vmem:[#allocation5 + $0x700] ss:$16 sps:$4 sm:$0xff]  }
  0x5a   :  { %1688 = vmatprep.subr.bf16.mxu1 %v2364_v57  ;;  %v2440_v46 = vld [vmem:[#allocation5 + $0x524] ss:$16 sps:$4 sm:$0xff]   ;;  %v2438_v49 = vld [vmem:[#allocation5 + $0x520] ss:$16 sps:$4 sm:$0xff]  }
  0x5b   :  { %v2443_v48 = vld [vmem:[#allocation5 + $0x724] ss:$16 sps:$4 sm:$0xff]   ;;  %v2441_v50 = vld [vmem:[#allocation5 + $0x720] ss:$16 sps:$4 sm:$0xff]  }
  0x5c   :  { %1648 = vmatpush1.bf16.msra.mxu0 %v2366_v58  ;;  %v2446_v52 = vld [vmem:[#allocation5 + $0x544] ss:$16 sps:$4 sm:$0xff]   ;;  %v2444_v54 = vld [vmem:[#allocation5 + $0x540] ss:$16 sps:$4 sm:$0xff]  }
  0x5d   :  { %1689 = vmatpush1.bf16.msra.mxu1 %v2367_v59  ;;  %1649 = vmatprep.subr.bf16.mxu0 %v2368_v60  ;;  %v2449_v53 = vld [vmem:[#allocation5 + $0x744] ss:$16 sps:$4 sm:$0xff]   ;;  %v2447_v55 = vld [vmem:[#allocation5 + $0x740] ss:$16 sps:$4 sm:$0xff]  }
  0x5e   :  { %1690 = vmatprep.subr.bf16.mxu1 %v2370_v61  ;;  %v2452_v56 = vld [vmem:[#allocation5 + $0x564] ss:$16 sps:$4 sm:$0xff]   ;;  %v2450_v58 = vld [vmem:[#allocation5 + $0x560] ss:$16 sps:$4 sm:$0xff]  }
  0x5f   :  { %v2455_v57 = vld [vmem:[#allocation5 + $0x764] ss:$16 sps:$4 sm:$0xff]   ;;  %v2453_v59 = vld [vmem:[#allocation5 + $0x760] ss:$16 sps:$4 sm:$0xff]  }
  0x60   :  { %1650 = vmatpush1.bf16.msra.mxu0 %v2372_v62  ;;  %v2458_v60 = vld [vmem:[#allocation5 + $0x584] ss:$16 sps:$4 sm:$0xff]   ;;  %v2456_v62 = vld [vmem:[#allocation5 + $0x580] ss:$16 sps:$4 sm:$0xff]  }
  0x61   :  { %1691 = vmatpush1.bf16.msra.mxu1 %v2373_v63  ;;  %1651 = vmatprep.subr.bf16.mxu0 %v2374_v0  ;;  %v2461_v61 = vld [vmem:[#allocation5 + $0x784] ss:$16 sps:$4 sm:$0xff]   ;;  %v2459_v63 = vld [vmem:[#allocation5 + $0x780] ss:$16 sps:$4 sm:$0xff]  }
  0x62   :  { %1692 = vmatprep.subr.bf16.mxu1 %v2376_v1  ;;  %v2464_v0 = vld [vmem:[#allocation5 + $0x5a4] ss:$16 sps:$4 sm:$0xff]  }
  0x63   :  { %v2467_v1 = vld [vmem:[#allocation5 + $0x7a4] ss:$16 sps:$4 sm:$0xff]  }
  0x64   :  { %1652 = vmatpush1.bf16.msra.mxu0 %v2378_v2  ;;  %v2462_v2 = vld [vmem:[#allocation5 + $0x5a0] ss:$16 sps:$4 sm:$0xff]  }
  0x65   :  { %1693 = vmatpush1.bf16.msra.mxu1 %v2379_v3  ;;  %1703 = vmatprep.subr.bf16.mxu0 %v2386_v4  ;;  %v2465_v3 = vld [vmem:[#allocation5 + $0x7a0] ss:$16 sps:$4 sm:$0xff]   ;;  %v2470_v4 = vld [vmem:[#allocation5 + $0x5c4] ss:$16 sps:$4 sm:$0xff]  }
  0x66   :  { %1744 = vmatprep.subr.bf16.mxu1 %v2389_v5  ;;  %v2473_v5 = vld [vmem:[#allocation5 + $0x7c4] ss:$16 sps:$4 sm:$0xff]  }
  0x67   :  { %1654 = vmatmul.mubr.bf16.vlgmr.msra.gmra.mrb[0].mxu0 %v2810_v6 }
  0x68   :  { %1695 = vmatmul.mubr.bf16.vlgmr.msra.gmra.mrb[0].mxu1 %v2812_v7  ;;  %1704 = vmatpush1.bf16.msra.mxu0 %v2384_v8  ;;  %v2468_v8 = vld [vmem:[#allocation5 + $0x5c0] ss:$16 sps:$4 sm:$0xff]  }
  0x69   :  { %1745 = vmatpush1.bf16.msra.mxu1 %v2387_v9  ;;  %1705 = vmatprep.subr.bf16.mxu0 %v2392_v10  ;;  %v2471_v9 = vld [vmem:[#allocation5 + $0x7c0] ss:$16 sps:$4 sm:$0xff]   ;;  %v2476_v10 = vld [vmem:[#allocation5 + $0x5e4] ss:$16 sps:$4 sm:$0xff]  }
  0x6a   :  { %1746 = vmatprep.subr.bf16.mxu1 %v2395_v11  ;;  %1735 = vmatprep.mubr.bf16.mxu0 %v2822_v36  ;;  %v2479_v11 = vld [vmem:[#allocation5 + $0x7e4] ss:$16 sps:$4 sm:$0xff]  }
  0x6b   :  { %1776 = vmatprep.mubr.bf16.mxu1 %v2826_v37 }
  0x6c   :  { %1706 = vmatpush1.bf16.msra.mxu0 %v2390_v12  ;;  %v2474_v12 = vld [vmem:[#allocation5 + $0x5e0] ss:$16 sps:$4 sm:$0xff]  }
  0x6d   :  { %1747 = vmatpush1.bf16.msra.mxu1 %v2393_v13  ;;  %1707 = vmatprep.subr.bf16.mxu0 %v2398_v14  ;;  %v2477_v13 = vld [vmem:[#allocation5 + $0x7e0] ss:$16 sps:$4 sm:$0xff]   ;;  %v2486_v14 = vld [vmem:[#allocation5 + $0xc] ss:$16 sps:$4 sm:$0xff]  }
  0x6e   :  { %1748 = vmatprep.subr.bf16.mxu1 %v2401_v15  ;;  %v2489_v15 = vld [vmem:[#allocation5 + $0x20c] ss:$16 sps:$4 sm:$0xff]  }
  0x70   :  { %1708 = vmatpush1.bf16.msra.mxu0 %v2396_v16  ;;  %v2832_v16 = vcombine.low %v2816_v32, %v2816_v32  ;;  %v2510_v32 = vld [vmem:[#allocation5 + $0x8c] ss:$16 sps:$4 sm:$0xff]  }
  0x71   :  { %1749 = vmatpush1.bf16.msra.mxu1 %v2399_v17  ;;  %1709 = vmatprep.subr.bf16.mxu0 %v2404_v18  ;;  %v2836_v17 = vcombine.low %v2818_v33, %v2818_v33  ;;  %v2484_v18 = vld [vmem:[#allocation5 + $0x8] ss:$16 sps:$4 sm:$0xff]   ;;  %v2513_v33 = vld [vmem:[#allocation5 + $0x28c] ss:$16 sps:$4 sm:$0xff]  }
  0x72   :  { %1750 = vmatprep.subr.bf16.mxu1 %v2407_v19  ;;  %v2487_v19 = vld [vmem:[#allocation5 + $0x208] ss:$16 sps:$4 sm:$0xff]  }
  0x74   :  { %1710 = vmatpush1.bf16.msra.mxu0 %v2402_v20  ;;  %v2492_v20 = vld [vmem:[#allocation5 + $0x2c] ss:$16 sps:$4 sm:$0xff]  }
  0x75   :  { %1751 = vmatpush1.bf16.msra.mxu1 %v2405_v21  ;;  %1711 = vmatprep.subr.bf16.mxu0 %v2410_v22  ;;  %v2495_v21 = vld [vmem:[#allocation5 + $0x22c] ss:$16 sps:$4 sm:$0xff]   ;;  %v2490_v22 = vld [vmem:[#allocation5 + $0x28] ss:$16 sps:$4 sm:$0xff]  }
  0x76   :  { %1752 = vmatprep.subr.bf16.mxu1 %v2413_v23  ;;  %v2493_v23 = vld [vmem:[#allocation5 + $0x228] ss:$16 sps:$4 sm:$0xff]  }
  0x78   :  { %1712 = vmatpush1.bf16.msra.mxu0 %v2408_v24  ;;  %v2498_v24 = vld [vmem:[#allocation5 + $0x4c] ss:$16 sps:$4 sm:$0xff]  }
  0x79   :  { %1753 = vmatpush1.bf16.msra.mxu1 %v2411_v25  ;;  %1713 = vmatprep.subr.bf16.mxu0 %v2416_v26  ;;  %v2501_v25 = vld [vmem:[#allocation5 + $0x24c] ss:$16 sps:$4 sm:$0xff]   ;;  %v2496_v26 = vld [vmem:[#allocation5 + $0x48] ss:$16 sps:$4 sm:$0xff]  }
  0x7a   :  { %1754 = vmatprep.subr.bf16.mxu1 %v2419_v27  ;;  %v2499_v27 = vld [vmem:[#allocation5 + $0x248] ss:$16 sps:$4 sm:$0xff]  }
  0x7c   :  { %1714 = vmatpush1.bf16.msra.mxu0 %v2414_v28  ;;  %v2504_v28 = vld [vmem:[#allocation5 + $0x6c] ss:$16 sps:$4 sm:$0xff]  }
  0x7d   :  { %1755 = vmatpush1.bf16.msra.mxu1 %v2417_v29  ;;  %1715 = vmatprep.subr.bf16.mxu0 %v2422_v30  ;;  %v2507_v29 = vld [vmem:[#allocation5 + $0x26c] ss:$16 sps:$4 sm:$0xff]   ;;  %v2502_v30 = vld [vmem:[#allocation5 + $0x68] ss:$16 sps:$4 sm:$0xff]  }
  0x7e   :  { %1756 = vmatprep.subr.bf16.mxu1 %v2425_v31  ;;  %v2505_v31 = vld [vmem:[#allocation5 + $0x268] ss:$16 sps:$4 sm:$0xff]  }
  0x80   :  { %1716 = vmatpush1.bf16.msra.mxu0 %v2420_v34  ;;  %v2508_v34 = vld [vmem:[#allocation5 + $0x88] ss:$16 sps:$4 sm:$0xff]  }
  0x81   :  { %1757 = vmatpush1.bf16.msra.mxu1 %v2423_v35  ;;  %1717 = vmatprep.subr.bf16.mxu0 %v2428_v38  ;;  %v2519_v35 = vld [vmem:[#allocation5 + $0x2ac] ss:$16 sps:$4 sm:$0xff]   ;;  %v2514_v38 = vld [vmem:[#allocation5 + $0xa8] ss:$16 sps:$4 sm:$0xff]  }
  0x82   :  { %1758 = vmatprep.subr.bf16.mxu1 %v2431_v39  ;;  %v2517_v39 = vld [vmem:[#allocation5 + $0x2a8] ss:$16 sps:$4 sm:$0xff]  }
  0x84   :  { %1718 = vmatpush1.bf16.msra.mxu0 %v2426_v40  ;;  %v2522_v40 = vld [vmem:[#allocation5 + $0xcc] ss:$16 sps:$4 sm:$0xff]  }
  0x85   :  { %1759 = vmatpush1.bf16.msra.mxu1 %v2429_v41  ;;  %1719 = vmatprep.subr.bf16.mxu0 %v2434_v42  ;;  %v2525_v41 = vld [vmem:[#allocation5 + $0x2cc] ss:$16 sps:$4 sm:$0xff]   ;;  %v2520_v42 = vld [vmem:[#allocation5 + $0xc8] ss:$16 sps:$4 sm:$0xff]  }
  0x86   :  { %1760 = vmatprep.subr.bf16.mxu1 %v2437_v43  ;;  %v2523_v43 = vld [vmem:[#allocation5 + $0x2c8] ss:$16 sps:$4 sm:$0xff]  }
  0x88   :  { %1720 = vmatpush1.bf16.msra.mxu0 %v2432_v44  ;;  %v2528_v44 = vld [vmem:[#allocation5 + $0xec] ss:$16 sps:$4 sm:$0xff]  }
  0x89   :  { %1761 = vmatpush1.bf16.msra.mxu1 %v2435_v45  ;;  %1721 = vmatprep.subr.bf16.mxu0 %v2440_v46  ;;  %v2531_v45 = vld [vmem:[#allocation5 + $0x2ec] ss:$16 sps:$4 sm:$0xff]   ;;  %v2526_v46 = vld [vmem:[#allocation5 + $0xe8] ss:$16 sps:$4 sm:$0xff]  }
  0x8a   :  { %1762 = vmatprep.subr.bf16.mxu1 %v2443_v48  ;;  %v2529_v48 = vld [vmem:[#allocation5 + $0x2e8] ss:$16 sps:$4 sm:$0xff]  }
  0x8c   :  { %1722 = vmatpush1.bf16.msra.mxu0 %v2438_v49  ;;  %v2534_v49 = vld [vmem:[#allocation5 + $0x10c] ss:$16 sps:$4 sm:$0xff]  }
  0x8d   :  { %1763 = vmatpush1.bf16.msra.mxu1 %v2441_v50  ;;  %1723 = vmatprep.subr.bf16.mxu0 %v2446_v52  ;;  %v2537_v50 = vld [vmem:[#allocation5 + $0x30c] ss:$16 sps:$4 sm:$0xff]   ;;  %v2532_v52 = vld [vmem:[#allocation5 + $0x108] ss:$16 sps:$4 sm:$0xff]  }
  0x8e   :  { %1764 = vmatprep.subr.bf16.mxu1 %v2449_v53  ;;  %v2535_v53 = vld [vmem:[#allocation5 + $0x308] ss:$16 sps:$4 sm:$0xff]  }
  0x90   :  { %1724 = vmatpush1.bf16.msra.mxu0 %v2444_v54  ;;  %v2540_v54 = vld [vmem:[#allocation5 + $0x12c] ss:$16 sps:$4 sm:$0xff]  }
  0x91   :  { %1765 = vmatpush1.bf16.msra.mxu1 %v2447_v55  ;;  %1725 = vmatprep.subr.bf16.mxu0 %v2452_v56  ;;  %v2543_v55 = vld [vmem:[#allocation5 + $0x32c] ss:$16 sps:$4 sm:$0xff]   ;;  %v2538_v56 = vld [vmem:[#allocation5 + $0x128] ss:$16 sps:$4 sm:$0xff]  }
  0x92   :  { %1766 = vmatprep.subr.bf16.mxu1 %v2455_v57  ;;  %v2541_v57 = vld [vmem:[#allocation5 + $0x328] ss:$16 sps:$4 sm:$0xff]  }
  0x94   :  { %1726 = vmatpush1.bf16.msra.mxu0 %v2450_v58  ;;  %v2546_v58 = vld [vmem:[#allocation5 + $0x14c] ss:$16 sps:$4 sm:$0xff]  }
  0x95   :  { %1767 = vmatpush1.bf16.msra.mxu1 %v2453_v59  ;;  %1727 = vmatprep.subr.bf16.mxu0 %v2458_v60  ;;  %v2549_v59 = vld [vmem:[#allocation5 + $0x34c] ss:$16 sps:$4 sm:$0xff]   ;;  %v2544_v60 = vld [vmem:[#allocation5 + $0x148] ss:$16 sps:$4 sm:$0xff]  }
  0x96   :  { %1768 = vmatprep.subr.bf16.mxu1 %v2461_v61  ;;  %v2547_v61 = vld [vmem:[#allocation5 + $0x348] ss:$16 sps:$4 sm:$0xff]  }
  0x98   :  { %1728 = vmatpush1.bf16.msra.mxu0 %v2456_v62  ;;  %v2552_v62 = vld [vmem:[#allocation5 + $0x16c] ss:$16 sps:$4 sm:$0xff]  }
  0x99   :  { %1769 = vmatpush1.bf16.msra.mxu1 %v2459_v63  ;;  %1729 = vmatprep.subr.bf16.mxu0 %v2464_v0  ;;  %v2555_v63 = vld [vmem:[#allocation5 + $0x36c] ss:$16 sps:$4 sm:$0xff]   ;;  %v2550_v0 = vld [vmem:[#allocation5 + $0x168] ss:$16 sps:$4 sm:$0xff]  }
  0x9a   :  { %1770 = vmatprep.subr.bf16.mxu1 %v2467_v1  ;;  %v2553_v1 = vld [vmem:[#allocation5 + $0x368] ss:$16 sps:$4 sm:$0xff]  }
  0x9c   :  { %1730 = vmatpush1.bf16.msra.mxu0 %v2462_v2  ;;  %v2558_v2 = vld [vmem:[#allocation5 + $0x18c] ss:$16 sps:$4 sm:$0xff]  }
  0x9d   :  { %1771 = vmatpush1.bf16.msra.mxu1 %v2465_v3  ;;  %1731 = vmatprep.subr.bf16.mxu0 %v2470_v4  ;;  %v2561_v3 = vld [vmem:[#allocation5 + $0x38c] ss:$16 sps:$4 sm:$0xff]   ;;  %v2556_v4 = vld [vmem:[#allocation5 + $0x188] ss:$16 sps:$4 sm:$0xff]  }
  0x9e   :  { %1772 = vmatprep.subr.bf16.mxu1 %v2473_v5  ;;  %v2559_v5 = vld [vmem:[#allocation5 + $0x388] ss:$16 sps:$4 sm:$0xff]  }
  0xa0   :  { %1732 = vmatpush1.bf16.msra.mxu0 %v2468_v8  ;;  %v2564_v8 = vld [vmem:[#allocation5 + $0x1ac] ss:$16 sps:$4 sm:$0xff]  }
  0xa1   :  { %1773 = vmatpush1.bf16.msra.mxu1 %v2471_v9  ;;  %1733 = vmatprep.subr.bf16.mxu0 %v2476_v10  ;;  %v2567_v9 = vld [vmem:[#allocation5 + $0x3ac] ss:$16 sps:$4 sm:$0xff]   ;;  %v2562_v10 = vld [vmem:[#allocation5 + $0x1a8] ss:$16 sps:$4 sm:$0xff]  }
  0xa2   :  { %1774 = vmatprep.subr.bf16.mxu1 %v2479_v11  ;;  %v2565_v11 = vld [vmem:[#allocation5 + $0x3a8] ss:$16 sps:$4 sm:$0xff]  }
  0xa4   :  { %1734 = vmatpush1.bf16.msra.mxu0 %v2474_v12  ;;  %v2570_v12 = vld [vmem:[#allocation5 + $0x1cc] ss:$16 sps:$4 sm:$0xff]  }
  0xa5   :  { %1775 = vmatpush1.bf16.msra.mxu1 %v2477_v13  ;;  %1785 = vmatprep.subr.bf16.mxu0 %v2486_v14  ;;  %v2573_v13 = vld [vmem:[#allocation5 + $0x3cc] ss:$16 sps:$4 sm:$0xff]   ;;  %v2568_v14 = vld [vmem:[#allocation5 + $0x1c8] ss:$16 sps:$4 sm:$0xff]  }
  0xa6   :  { %1826 = vmatprep.subr.bf16.mxu1 %v2489_v15  ;;  %v2571_v15 = vld [vmem:[#allocation5 + $0x3c8] ss:$16 sps:$4 sm:$0xff]  }
  0xa7   :  { %1736 = vmatmul.mubr.bf16.vlgmr.msra.gmra.mrb[4].mxu0 %v2832_v16 }
  0xa8   :  { %1777 = vmatmul.mubr.bf16.vlgmr.msra.gmra.mrb[4].mxu1 %v2836_v17  ;;  %1786 = vmatpush1.bf16.msra.mxu0 %v2484_v18  ;;  %v2576_v18 = vld [vmem:[#allocation5 + $0x1ec] ss:$16 sps:$4 sm:$0xff]  }
  0xa9   :  { %1827 = vmatpush1.bf16.msra.mxu1 %v2487_v19  ;;  %1787 = vmatprep.subr.bf16.mxu0 %v2492_v20  ;;  %v2579_v19 = vld [vmem:[#allocation5 + $0x3ec] ss:$16 sps:$4 sm:$0xff]   ;;  %v2574_v20 = vld [vmem:[#allocation5 + $0x1e8] ss:$16 sps:$4 sm:$0xff]  }
  0xaa   :  { %1828 = vmatprep.subr.bf16.mxu1 %v2495_v21  ;;  %1817 = vmatprep.mubr.bf16.mxu0 %v2804_v47  ;;  %v2511_v47 = vld [vmem:[#allocation5 + $0x288] ss:$16 sps:$4 sm:$0xff]  }
  0xab   :  { %1858 = vmatprep.mubr.bf16.mxu1 %v2806_v51  ;;  %v2516_v51 = vld [vmem:[#allocation5 + $0xac] ss:$16 sps:$4 sm:$0xff]   ;;  %v2577_v21 = vld [vmem:[#allocation5 + $0x3e8] ss:$16 sps:$4 sm:$0xff]  }
  0xac   :  { %1788 = vmatpush1.bf16.msra.mxu0 %v2490_v22  ;;  %v2582_v22 = vld [vmem:[#allocation5 + $0x40c] ss:$16 sps:$4 sm:$0xff]  }
  0xad   :  { %1829 = vmatpush1.bf16.msra.mxu1 %v2493_v23  ;;  %1789 = vmatprep.subr.bf16.mxu0 %v2498_v24  ;;  %v2585_v23 = vld [vmem:[#allocation5 + $0x60c] ss:$16 sps:$4 sm:$0xff]   ;;  %v2580_v24 = vld [vmem:[#allocation5 + $0x408] ss:$16 sps:$4 sm:$0xff]  }
  0xae   :  { %1830 = vmatprep.subr.bf16.mxu1 %v2501_v25  ;;  %v2583_v25 = vld [vmem:[#allocation5 + $0x608] ss:$16 sps:$4 sm:$0xff]  }
  0xb0   :  { %1790 = vmatpush1.bf16.msra.mxu0 %v2496_v26  ;;  %v2588_v26 = vld [vmem:[#allocation5 + $0x42c] ss:$16 sps:$4 sm:$0xff]  }
  0xb1   :  { %1831 = vmatpush1.bf16.msra.mxu1 %v2499_v27  ;;  %1791 = vmatprep.subr.bf16.mxu0 %v2504_v28  ;;  %v2591_v27 = vld [vmem:[#allocation5 + $0x62c] ss:$16 sps:$4 sm:$0xff]   ;;  %v2586_v28 = vld [vmem:[#allocation5 + $0x428] ss:$16 sps:$4 sm:$0xff]  }
  0xb2   :  { %1832 = vmatprep.subr.bf16.mxu1 %v2507_v29  ;;  %v2589_v29 = vld [vmem:[#allocation5 + $0x628] ss:$16 sps:$4 sm:$0xff]  }
  0xb4   :  { %1792 = vmatpush1.bf16.msra.mxu0 %v2502_v30  ;;  %v2594_v30 = vld [vmem:[#allocation5 + $0x44c] ss:$16 sps:$4 sm:$0xff]  }
  0xb5   :  { %1833 = vmatpush1.bf16.msra.mxu1 %v2505_v31  ;;  %1793 = vmatprep.subr.bf16.mxu0 %v2510_v32  ;;  %v2597_v31 = vld [vmem:[#allocation5 + $0x64c] ss:$16 sps:$4 sm:$0xff]   ;;  %v2592_v32 = vld [vmem:[#allocation5 + $0x448] ss:$16 sps:$4 sm:$0xff]  }
  0xb6   :  { %1834 = vmatprep.subr.bf16.mxu1 %v2513_v33  ;;  %v2595_v33 = vld [vmem:[#allocation5 + $0x648] ss:$16 sps:$4 sm:$0xff]  }
  0xb8   :  { %1794 = vmatpush1.bf16.msra.mxu0 %v2508_v34  ;;  %v2598_v34 = vld [vmem:[#allocation5 + $0x468] ss:$16 sps:$4 sm:$0xff]  }
  0xb9   :  { %1835 = vmatpush1.bf16.msra.mxu1 %v2511_v47  ;;  %1795 = vmatprep.subr.bf16.mxu0 %v2516_v51  ;;  %v2601_v47 = vld [vmem:[#allocation5 + $0x668] ss:$16 sps:$4 sm:$0xff]   ;;  %v2606_v51 = vld [vmem:[#allocation5 + $0x48c] ss:$16 sps:$4 sm:$0xff]  }
  0xba   :  { %1836 = vmatprep.subr.bf16.mxu1 %v2519_v35  ;;  %v2609_v35 = vld [vmem:[#allocation5 + $0x68c] ss:$16 sps:$4 sm:$0xff]  }
  0xbc   :  { %1796 = vmatpush1.bf16.msra.mxu0 %v2514_v38  ;;  %v2612_v38 = vld [vmem:[#allocation5 + $0x4ac] ss:$16 sps:$4 sm:$0xff]  }
  0xbd   :  { %1837 = vmatpush1.bf16.msra.mxu1 %v2517_v39  ;;  %1797 = vmatprep.subr.bf16.mxu0 %v2522_v40  ;;  %v2615_v39 = vld [vmem:[#allocation5 + $0x6ac] ss:$16 sps:$4 sm:$0xff]   ;;  %v2610_v40 = vld [vmem:[#allocation5 + $0x4a8] ss:$16 sps:$4 sm:$0xff]  }
  0xbe   :  { %1838 = vmatprep.subr.bf16.mxu1 %v2525_v41  ;;  %v2613_v41 = vld [vmem:[#allocation5 + $0x6a8] ss:$16 sps:$4 sm:$0xff]  }
  0xc0   :  { %1798 = vmatpush1.bf16.msra.mxu0 %v2520_v42  ;;  %v2618_v42 = vld [vmem:[#allocation5 + $0x4cc] ss:$16 sps:$4 sm:$0xff]  }
  0xc1   :  { %1839 = vmatpush1.bf16.msra.mxu1 %v2523_v43  ;;  %1799 = vmatprep.subr.bf16.mxu0 %v2528_v44  ;;  %v2621_v43 = vld [vmem:[#allocation5 + $0x6cc] ss:$16 sps:$4 sm:$0xff]   ;;  %v2616_v44 = vld [vmem:[#allocation5 + $0x4c8] ss:$16 sps:$4 sm:$0xff]  }
  0xc2   :  { %1840 = vmatprep.subr.bf16.mxu1 %v2531_v45  ;;  %v2619_v45 = vld [vmem:[#allocation5 + $0x6c8] ss:$16 sps:$4 sm:$0xff]  }
  0xc4   :  { %1800 = vmatpush1.bf16.msra.mxu0 %v2526_v46  ;;  %v2624_v46 = vld [vmem:[#allocation5 + $0x4ec] ss:$16 sps:$4 sm:$0xff]  }
  0xc5   :  { %1841 = vmatpush1.bf16.msra.mxu1 %v2529_v48  ;;  %1801 = vmatprep.subr.bf16.mxu0 %v2534_v49  ;;  %v2627_v48 = vld [vmem:[#allocation5 + $0x6ec] ss:$16 sps:$4 sm:$0xff]   ;;  %v2622_v49 = vld [vmem:[#allocation5 + $0x4e8] ss:$16 sps:$4 sm:$0xff]  }
  0xc6   :  { %1842 = vmatprep.subr.bf16.mxu1 %v2537_v50  ;;  %v2625_v50 = vld [vmem:[#allocation5 + $0x6e8] ss:$16 sps:$4 sm:$0xff]  }
  0xc8   :  { %1802 = vmatpush1.bf16.msra.mxu0 %v2532_v52  ;;  %v2630_v52 = vld [vmem:[#allocation5 + $0x50c] ss:$16 sps:$4 sm:$0xff]  }
  0xc9   :  { %1843 = vmatpush1.bf16.msra.mxu1 %v2535_v53  ;;  %1803 = vmatprep.subr.bf16.mxu0 %v2540_v54  ;;  %v2633_v53 = vld [vmem:[#allocation5 + $0x70c] ss:$16 sps:$4 sm:$0xff]   ;;  %v2628_v54 = vld [vmem:[#allocation5 + $0x508] ss:$16 sps:$4 sm:$0xff]  }
  0xca   :  { %1844 = vmatprep.subr.bf16.mxu1 %v2543_v55  ;;  %v2631_v55 = vld [vmem:[#allocation5 + $0x708] ss:$16 sps:$4 sm:$0xff]  }
  0xcc   :  { %1804 = vmatpush1.bf16.msra.mxu0 %v2538_v56  ;;  %v2636_v56 = vld [vmem:[#allocation5 + $0x52c] ss:$16 sps:$4 sm:$0xff]  }
  0xcd   :  { %1845 = vmatpush1.bf16.msra.mxu1 %v2541_v57  ;;  %1805 = vmatprep.subr.bf16.mxu0 %v2546_v58  ;;  %v2639_v57 = vld [vmem:[#allocation5 + $0x72c] ss:$16 sps:$4 sm:$0xff]   ;;  %v2634_v58 = vld [vmem:[#allocation5 + $0x528] ss:$16 sps:$4 sm:$0xff]  }
  0xce   :  { %1846 = vmatprep.subr.bf16.mxu1 %v2549_v59  ;;  %v2637_v59 = vld [vmem:[#allocation5 + $0x728] ss:$16 sps:$4 sm:$0xff]  }
  0xd0   :  { %1806 = vmatpush1.bf16.msra.mxu0 %v2544_v60  ;;  %v2642_v60 = vld [vmem:[#allocation5 + $0x54c] ss:$16 sps:$4 sm:$0xff]  }
  0xd1   :  { %1847 = vmatpush1.bf16.msra.mxu1 %v2547_v61  ;;  %1807 = vmatprep.subr.bf16.mxu0 %v2552_v62  ;;  %v2645_v61 = vld [vmem:[#allocation5 + $0x74c] ss:$16 sps:$4 sm:$0xff]   ;;  %v2640_v62 = vld [vmem:[#allocation5 + $0x548] ss:$16 sps:$4 sm:$0xff]  }
  0xd2   :  { %1848 = vmatprep.subr.bf16.mxu1 %v2555_v63  ;;  %v2643_v63 = vld [vmem:[#allocation5 + $0x748] ss:$16 sps:$4 sm:$0xff]  }
  0xd4   :  { %1808 = vmatpush1.bf16.msra.mxu0 %v2550_v0  ;;  %v2648_v0 = vld [vmem:[#allocation5 + $0x56c] ss:$16 sps:$4 sm:$0xff]  }
  0xd5   :  { %1849 = vmatpush1.bf16.msra.mxu1 %v2553_v1  ;;  %1809 = vmatprep.subr.bf16.mxu0 %v2558_v2  ;;  %v2651_v1 = vld [vmem:[#allocation5 + $0x76c] ss:$16 sps:$4 sm:$0xff]   ;;  %v2646_v2 = vld [vmem:[#allocation5 + $0x568] ss:$16 sps:$4 sm:$0xff]  }
  0xd6   :  { %1850 = vmatprep.subr.bf16.mxu1 %v2561_v3  ;;  %v2649_v3 = vld [vmem:[#allocation5 + $0x768] ss:$16 sps:$4 sm:$0xff]  }
  0xd8   :  { %1810 = vmatpush1.bf16.msra.mxu0 %v2556_v4  ;;  %v2654_v4 = vld [vmem:[#allocation5 + $0x58c] ss:$16 sps:$4 sm:$0xff]  }
  0xd9   :  { %1851 = vmatpush1.bf16.msra.mxu1 %v2559_v5  ;;  %1811 = vmatprep.subr.bf16.mxu0 %v2564_v8  ;;  %v2657_v5 = vld [vmem:[#allocation5 + $0x78c] ss:$16 sps:$4 sm:$0xff]   ;;  %v2652_v8 = vld [vmem:[#allocation5 + $0x588] ss:$16 sps:$4 sm:$0xff]  }
  0xda   :  { %1852 = vmatprep.subr.bf16.mxu1 %v2567_v9  ;;  %v2655_v9 = vld [vmem:[#allocation5 + $0x788] ss:$16 sps:$4 sm:$0xff]  }
  0xdc   :  { %1812 = vmatpush1.bf16.msra.mxu0 %v2562_v10  ;;  %v2660_v10 = vld [vmem:[#allocation5 + $0x5ac] ss:$16 sps:$4 sm:$0xff]  }
  0xdd   :  { %1853 = vmatpush1.bf16.msra.mxu1 %v2565_v11  ;;  %1813 = vmatprep.subr.bf16.mxu0 %v2570_v12  ;;  %v2663_v11 = vld [vmem:[#allocation5 + $0x7ac] ss:$16 sps:$4 sm:$0xff]   ;;  %v2658_v12 = vld [vmem:[#allocation5 + $0x5a8] ss:$16 sps:$4 sm:$0xff]  }
  0xde   :  { %1854 = vmatprep.subr.bf16.mxu1 %v2573_v13  ;;  %v2661_v13 = vld [vmem:[#allocation5 + $0x7a8] ss:$16 sps:$4 sm:$0xff]  }
  0xe0   :  { %1814 = vmatpush1.bf16.msra.mxu0 %v2568_v14  ;;  %v2666_v14 = vld [vmem:[#allocation5 + $0x5cc] ss:$16 sps:$4 sm:$0xff]  }
  0xe1   :  { %1855 = vmatpush1.bf16.msra.mxu1 %v2571_v15  ;;  %1815 = vmatprep.subr.bf16.mxu0 %v2576_v18  ;;  %v2669_v15 = vld [vmem:[#allocation5 + $0x7cc] ss:$16 sps:$4 sm:$0xff]   ;;  %v2664_v18 = vld [vmem:[#allocation5 + $0x5c8] ss:$16 sps:$4 sm:$0xff]  }
  0xe2   :  { %1856 = vmatprep.subr.bf16.mxu1 %v2579_v19  ;;  %v2667_v19 = vld [vmem:[#allocation5 + $0x7c8] ss:$16 sps:$4 sm:$0xff]  }
  0xe4   :  { %1816 = vmatpush1.bf16.msra.mxu0 %v2574_v20  ;;  %v2672_v20 = vld [vmem:[#allocation5 + $0x5ec] ss:$16 sps:$4 sm:$0xff]  }
  0xe5   :  { %1857 = vmatpush1.bf16.msra.mxu1 %v2577_v21  ;;  %1867 = vmatprep.subr.bf16.mxu0 %v2582_v22  ;;  %v2675_v21 = vld [vmem:[#allocation5 + $0x7ec] ss:$16 sps:$4 sm:$0xff]   ;;  %v2670_v22 = vld [vmem:[#allocation5 + $0x5e8] ss:$16 sps:$4 sm:$0xff]  }
  0xe6   :  { %1908 = vmatprep.subr.bf16.mxu1 %v2585_v23  ;;  %v2673_v23 = vld [vmem:[#allocation5 + $0x7e8] ss:$16 sps:$4 sm:$0xff]  }
  0xe7   :  { %1818 = vmatmul.mubr.bf16.vlgmr.msra.gmra.mrb[8].mxu0 %v2810_v6  ;;  %v2600_v6 = vld [vmem:[#allocation5 + $0x46c] ss:$16 sps:$4 sm:$0xff]  }
  0xe8   :  { %1859 = vmatmul.mubr.bf16.vlgmr.msra.gmra.mrb[8].mxu1 %v2812_v7  ;;  %1868 = vmatpush1.bf16.msra.mxu0 %v2580_v24  ;;  %v2603_v7 = vld [vmem:[#allocation5 + $0x66c] ss:$16 sps:$4 sm:$0xff]  }
  0xe9   :  { %1909 = vmatpush1.bf16.msra.mxu1 %v2583_v25  ;;  %1869 = vmatprep.subr.bf16.mxu0 %v2588_v26 }
  0xea   :  { %1910 = vmatprep.subr.bf16.mxu1 %v2591_v27  ;;  %1899 = vmatprep.mubr.bf16.mxu0 %v2822_v36  ;;  %v2604_v36 = vld [vmem:[#allocation5 + $0x488] ss:$16 sps:$4 sm:$0xff]  }
  0xeb   :  { %1940 = vmatprep.mubr.bf16.mxu1 %v2826_v37  ;;  %v2607_v37 = vld [vmem:[#allocation5 + $0x688] ss:$16 sps:$4 sm:$0xff]  }
  0xec   :  { %1870 = vmatpush1.bf16.msra.mxu0 %v2586_v28 }
  0xed   :  { %1911 = vmatpush1.bf16.msra.mxu1 %v2589_v29  ;;  %1871 = vmatprep.subr.bf16.mxu0 %v2594_v30 }
  0xee   :  { %1912 = vmatprep.subr.bf16.mxu1 %v2597_v31 }
  0xf0   :  { %1872 = vmatpush1.bf16.msra.mxu0 %v2592_v32 }
  0xf1   :  { %1913 = vmatpush1.bf16.msra.mxu1 %v2595_v33  ;;  %1873 = vmatprep.subr.bf16.mxu0 %v2600_v6  ;;  %v1966_v6 = vlaneseq }
  0xf2   :  { %1914 = vmatprep.subr.bf16.mxu1 %v2603_v7 }
  0xf3   :  { %v1967_v7 = vshrl.u32 %v1966_v6, 7 }
  0xf4   :  { %1874 = vmatpush1.bf16.msra.mxu0 %v2598_v34 }
  0xf5   :  { %1915 = vmatpush1.bf16.msra.mxu1 %v2601_v47  ;;  %1875 = vmatprep.subr.bf16.mxu0 %v2606_v51  ;;  %v1968_v34 = vsub.s32 0, %v1967_v7 }
  0xf6   :  { %1916 = vmatprep.subr.bf16.mxu1 %v2609_v35 }
  0xf8   :  { %1876 = vmatpush1.bf16.msra.mxu0 %v2604_v36 }
  0xf9   :  { %1917 = vmatpush1.bf16.msra.mxu1 %v2607_v37  ;;  %1877 = vmatprep.subr.bf16.mxu0 %v2612_v38 }
  0xfa   :  { %1918 = vmatprep.subr.bf16.mxu1 %v2615_v39 }
  0xfc   :  { %1878 = vmatpush1.bf16.msra.mxu0 %v2610_v40 }
  0xfd   :  { %1919 = vmatpush1.bf16.msra.mxu1 %v2613_v41  ;;  %1879 = vmatprep.subr.bf16.mxu0 %v2618_v42 }
  0xfe   :  { %1920 = vmatprep.subr.bf16.mxu1 %v2621_v43 }
 0x100   :  { %1880 = vmatpush1.bf16.msra.mxu0 %v2616_v44 }
 0x101   :  { %1921 = vmatpush1.bf16.msra.mxu1 %v2619_v45  ;;  %1881 = vmatprep.subr.bf16.mxu0 %v2624_v46 }
 0x102   :  { %1922 = vmatprep.subr.bf16.mxu1 %v2627_v48 }
 0x104   :  { %1882 = vmatpush1.bf16.msra.mxu0 %v2622_v49 }
 0x105   :  { %1923 = vmatpush1.bf16.msra.mxu1 %v2625_v50  ;;  %1883 = vmatprep.subr.bf16.mxu0 %v2630_v52 }
 0x106   :  { %1924 = vmatprep.subr.bf16.mxu1 %v2633_v53 }
 0x108   :  { %1884 = vmatpush1.bf16.msra.mxu0 %v2628_v54 }
 0x109   :  { %1925 = vmatpush1.bf16.msra.mxu1 %v2631_v55  ;;  %1885 = vmatprep.subr.bf16.mxu0 %v2636_v56 }
 0x10a   :  { %1926 = vmatprep.subr.bf16.mxu1 %v2639_v57 }
 0x10c   :  { %1886 = vmatpush1.bf16.msra.mxu0 %v2634_v58 }
 0x10d   :  { %1927 = vmatpush1.bf16.msra.mxu1 %v2637_v59  ;;  %1887 = vmatprep.subr.bf16.mxu0 %v2642_v60 }
 0x10e   :  { %1928 = vmatprep.subr.bf16.mxu1 %v2645_v61 }
 0x110   :  { %1888 = vmatpush1.bf16.msra.mxu0 %v2640_v62 }
 0x111   :  { %1929 = vmatpush1.bf16.msra.mxu1 %v2643_v63  ;;  %1889 = vmatprep.subr.bf16.mxu0 %v2648_v0  ;;  %v1976_v63 = vsub.s32 2, %v1967_v7 }
 0x112   :  { %1930 = vmatprep.subr.bf16.mxu1 %v2651_v1 }
 0x114   :  { %1890 = vmatpush1.bf16.msra.mxu0 %v2646_v2  ;;  %v1980_v2 = vsub.s32 3, %v1967_v7 }
 0x115   :  { %1931 = vmatpush1.bf16.msra.mxu1 %v2649_v3  ;;  %1891 = vmatprep.subr.bf16.mxu0 %v2654_v4 }
 0x116   :  { %1932 = vmatprep.subr.bf16.mxu1 %v2657_v5 }
 0x118   :  { %1892 = vmatpush1.bf16.msra.mxu0 %v2652_v8 }
 0x119   :  { %1933 = vmatpush1.bf16.msra.mxu1 %v2655_v9  ;;  %1893 = vmatprep.subr.bf16.mxu0 %v2660_v10 }
 0x11a   :  { %1934 = vmatprep.subr.bf16.mxu1 %v2663_v11 }
 0x11c   :  { %1894 = vmatpush1.bf16.msra.mxu0 %v2658_v12 }
 0x11d   :  { %1935 = vmatpush1.bf16.msra.mxu1 %v2661_v13  ;;  %1895 = vmatprep.subr.bf16.mxu0 %v2666_v14 }
 0x11e   :  { %1936 = vmatprep.subr.bf16.mxu1 %v2669_v15 }
 0x120   :  { %1896 = vmatpush1.bf16.msra.mxu0 %v2664_v18 }
 0x121   :  { %1937 = vmatpush1.bf16.msra.mxu1 %v2667_v19  ;;  %1897 = vmatprep.subr.bf16.mxu0 %v2672_v20 }
 0x122   :  { %1938 = vmatprep.subr.bf16.mxu1 %v2675_v21 }
 0x124   :  { %1898 = vmatpush1.bf16.msra.mxu0 %v2670_v22 }
 0x125   :  { %1939 = vmatpush1.bf16.msra.mxu1 %v2673_v23 }
 0x127   :  { %1900 = vmatmul.mubr.bf16.vlgmr.msra.gmra.mrb[12].mxu0 %v2832_v16  ;;  %v1964_v16 = vld [vmem:[%s2865_s2] sm:$0xf]  ;;  %s2752_s2 = smov [#allocation7]  }
 0x128   :  { %1941 = vmatmul.mubr.bf16.vlgmr.msra.gmra.mrb[12].mxu1 %v2836_v17  ;;  %v1972_v17 = vsub.s32 1, %v1967_v7  ;;  %v1969_v44 = vrot.slane %v1964_v16, %v1968_v34  ;;  %v1977_v14 = vrot.slane %v1964_v16, %v1976_v63  ;;  %v1981_v18 = vrot.slane %v1964_v16, %v1980_v2  ;;  %s2004_s11 = sshll.u32 %s2752_s2, 4  ;;  %s2005_s11 = int_to_ptr.vmem [resolvable:$true] %s2004_s11 }
 0x129   :  { %s2720_s12 = scalar_lea.vmem %s2005_s11, 512  ;;  %p2725_p3 = scmp.lt.s32.totalorder %s2005_s11, %s2005_s11 }
 0x12a   :  { %v1973_v46 = vrot.slane %v1964_v16, %v1972_v17  ;;  %p2721_p2 = scmp.ne.s32.totalorder %s2005_s11, %s2720_s12  ;;  %p2726_p4 = scmp.lt.s32.totalorder %s2720_s12, %s2720_s12 }
 0x12c   :  { %p2727_p5 = por %p2726_p4, %p2725_p3 }
 0x12e   :  { %p2728_p6 = pnand %p2727_p5, %p2721_p2 }
 0x13a   :  { %v1655_v24 = vpop.f32.mrb[0].mxu0 }
 0x13b   :  { %v1696_v25 = vpop.f32.mrb[0].mxu1  ;;  %v1657_v27 = vpop.f32.mrb[1].mxu0 }
 0x13c   :  { %v1697_v26 = vadd.f32 %v1696_v25, %v1655_v24  ;;  %v1698_v28 = vpop.f32.mrb[1].mxu1  ;;  %v1659_v30 = vpop.f32.mrb[2].mxu0 }
 0x13d   :  { %v1699_v29 = vadd.f32 %v1698_v28, %v1657_v27  ;;  %v1700_v31 = vpop.f32.mrb[2].mxu1  ;;  %v1660_v32 = vpop.f32.mrb[3].mxu0 }
 0x13e   :  { %v1701_v33 = vpop.f32.mrb[3].mxu1 }
 0x17a   :  { %v1737_v47 = vpop.f32.mrb[4].mxu0 }
 0x17b   :  { %v1778_v51 = vpop.f32.mrb[4].mxu1  ;;  %v1738_v35 = vadd.f32 %v1737_v47, %v1697_v26  ;;  %v1739_v36 = vpop.f32.mrb[5].mxu0 }
 0x17c   :  { %v1780_v37 = vpop.f32.mrb[5].mxu1  ;;  %v1740_v38 = vadd.f32 %v1739_v36, %v1699_v29  ;;  %v1741_v39 = vpop.f32.mrb[6].mxu0 }
 0x17d   :  { %v1782_v40 = vpop.f32.mrb[6].mxu1  ;;  %v1779_v41 = vadd.f32 %v1778_v51, %v1738_v35  ;;  %v1742_v42 = vpop.f32.mrb[7].mxu0 }
 0x17e   :  { %v1783_v43 = vpop.f32.mrb[7].mxu1  ;;  %v1781_v45 = vadd.f32 %v1780_v37, %v1740_v38 }
 0x17f   :  { %v1986_v48 = vadd.f32 %v1969_v44, %v1779_v41 }
 0x180   :  { %v1987_v49 = vadd.f32 %v1973_v46, %v1781_v45 }
 0x181   :  { %v1990_v50 = vmax.f32 %v1986_v48, 0.0 }
 0x182   :  { %v1991_v52 = vmax.f32 %v1987_v49, 0.0 }
 0x183   :  { %1994 = vst [vmem:[#allocation7] sm:$0xff] %v1990_v50 }
 0x184   :  { %1995 = vst [vmem:[#allocation7 + $0x8] sm:$0xff] %v1991_v52 }
 0x1ba   :  { %v1819_v53 = vpop.f32.mrb[8].mxu0 }
 0x1bb   :  { %v1860_v54 = vpop.f32.mrb[8].mxu1  ;;  %v1821_v56 = vpop.f32.mrb[9].mxu0 }
 0x1bc   :  { %v1861_v55 = vadd.f32 %v1860_v54, %v1819_v53  ;;  %v1862_v57 = vpop.f32.mrb[9].mxu1  ;;  %v1823_v59 = vpop.f32.mrb[10].mxu0 }
 0x1bd   :  { %v1863_v58 = vadd.f32 %v1862_v57, %v1821_v56  ;;  %v1864_v60 = vpop.f32.mrb[10].mxu1  ;;  %v1824_v61 = vpop.f32.mrb[11].mxu0 }
 0x1be   :  { %v1865_v62 = vpop.f32.mrb[11].mxu1 }
 0x1fa   :  { %v1901_v0 = vpop.f32.mrb[12].mxu0 }
 0x1fb   :  { %v1942_v1 = vpop.f32.mrb[12].mxu1  ;;  %v1902_v3 = vadd.f32 %v1901_v0, %v1861_v55  ;;  %v1903_v4 = vpop.f32.mrb[13].mxu0 }
 0x1fc   :  { %v1944_v5 = vpop.f32.mrb[13].mxu1  ;;  %v1904_v8 = vadd.f32 %v1903_v4, %v1863_v58  ;;  %v1905_v9 = vpop.f32.mrb[14].mxu0 }
 0x1fd   :  { %v1946_v10 = vpop.f32.mrb[14].mxu1  ;;  %v1943_v11 = vadd.f32 %v1942_v1, %v1902_v3  ;;  %v1906_v12 = vpop.f32.mrb[15].mxu0 }
 0x1fe   :  { %v1947_v13 = vpop.f32.mrb[15].mxu1  ;;  %v1945_v15 = vadd.f32 %v1944_v5, %v1904_v8 }
 0x1ff   :  { %v1988_v19 = vadd.f32 %v1977_v14, %v1943_v11 }
 0x200   :  { %v1989_v20 = vadd.f32 %v1981_v18, %v1945_v15 }
 0x201   :  { %v1992_v21 = vmax.f32 %v1988_v19, 0.0 }
 0x202   :  { %v1993_v22 = vmax.f32 %v1989_v20, 0.0 }
 0x203   :  { %1996 = vst [vmem:[#allocation7 + $0x10] sm:$0xff] %v1992_v21 }
 0x204   :  { %1997 = vst [vmem:[#allocation7 + $0x18] sm:$0xff] %v1993_v22 }
 0x205   :  { %2731 = shalt.err (!%p2728_p6)
}
 0x206   :  { %s2732_s15 = scalar_lea.hbm %s2866_s3, 512 }
 0x207   :  { %p2733_p7 = scmp.ne.s32.totalorder %s2866_s3, %s2732_s15  ;;  %p2736_p8 = scmp.lt.u32.totalorder %s2732_s15, %s2866_s3 }
 0x209   :  { %p2738_p9 = pnand %p2736_p8, %p2733_p7 }
 0x20b   :  { %2741 = shalt.err (!%p2738_p9)
}
 0x20c   :  { %2007 = dma.vmem_to_hbm [thread:$0]  %s2005_s11, 512, %s2866_s3, [#allocation4]  }
 0x20d   :  { %2746 = dma.done.wait [#allocation4], 512  }
 0x20e   :  { %2747 = vsyncadd [#allocation4], 4294966784 }
 0x20f   :  { %2011 = vsyncpa [#allocation3], 1 }
 0x210   :  { %2012 = vsyncpa [#allocation6], 1 }
 0x211   :  { %2013 = vsyncpa [#allocation4], 1 }

</bundles_post_ra>
